<compile_context>
chip_gen: v6e
topology: v6e:2x2x1
jax: 0.10.0
libtpu: 0.0.40
codegen_flags: <defaults>
</compile_context>

<pallas_src>
import functools

import jax
import jax.numpy as jnp
from jax import lax
from jax.experimental import pallas as pl
from jax.experimental.pallas import tpu as pltpu

HIDDEN1 = 64
HIDDEN2 = 32


def _mlp_kernel(x_ref, w1_ref, b1_ref, w2_ref, b2_ref, w3_ref, b3_ref, o_ref,
                *, mxu_bf16: bool):
    x = x_ref[...]                     # (tb, D)  natural layout, no wrapper transpose
    w1 = w1_ref[...]                   # (64, D)
    w2 = w2_ref[...]                   # (32, 64)

    if mxu_bf16:
        # Single-pass bf16 MXU operands, f32 accumulation.
        x = x.astype(jnp.bfloat16)
        w1 = w1.astype(jnp.bfloat16)
        w2 = w2.astype(jnp.bfloat16)
        prec = None
    else:
        # Explicit true-f32 matmuls (multi-pass MXU) for tight numerics.
        prec = lax.Precision.HIGHEST

    # Layer 1: contract D of W1 with D of x  ->  (64, tb); batch on lanes.
    h1 = lax.dot_general(w1, x, (((1,), (1,)), ((), ())),
                         preferred_element_type=jnp.float32, precision=prec)
    h1 = jnp.maximum(h1 + b1_ref[...], 0.0)              # f32 bias + ReLU (VPU)

    # Layer 2: (32, 64) @ (64, tb) -> (32, tb).
    h1_op = h1.astype(jnp.bfloat16) if mxu_bf16 else h1
    h2 = lax.dot_general(w2, h1_op, (((1,), (0,)), ((), ())),
                         preferred_element_type=jnp.float32, precision=prec)
    h2 = jnp.maximum(h2 + b2_ref[...], 0.0)              # f32 bias + ReLU (VPU)

    # Layer 3 (output width 1): VPU multiply + XLU sublane reduce, f32.
    o = jnp.sum(w3_ref[...] * h2, axis=0, keepdims=True) + b3_ref[...]   # (1, tb)
    o_ref[...] = o.astype(o_ref.dtype)                   # lane-dense store


def transaction_predictor(x, params, *, tile_b=8192, mxu_bf16=False):
    """x: (B, input_dim) float32 -> (B, 1) float32."""
    w1, b1, w2, b2, w3, b3 = params
    B, D = x.shape

    # Round the tile to the 128-lane granule.
    tile_b = max(128, ((int(tile_b) + 127) // 128) * 128)
    if B <= 256:
        tb = B                         # single block: block dim == full dim is legal
    else:
        # Clamp so the grid has >= 2 steps: lets ("parallel",) shard the batch
        # across v7x's two TensorCores instead of leaving one idle.
        half = ((pl.cdiv(B, 2) + 127) // 128) * 128
        tb = min(tile_b, half)

    grid = (pl.cdiv(B, tb),)           # ragged last block handled by Pallas (no pad)
    resident = lambda a: pl.BlockSpec(a.shape, lambda i: (0, 0))  # VMEM-resident params

    kernel = functools.partial(_mlp_kernel, mxu_bf16=mxu_bf16)
    out_t = pl.pallas_call(
        kernel,
        out_shape=jax.ShapeDtypeStruct((1, B), jnp.float32),
        grid=grid,
        in_specs=[
            pl.BlockSpec((tb, D), lambda i: (i, 0)),     # x tile, natural (B, D) layout
            resident(w1), resident(b1),
            resident(w2), resident(b2),
            resident(w3), resident(b3),
        ],
        out_specs=pl.BlockSpec((1, tb), lambda i: (0, i)),  # lane-dense output tile
        compiler_params=pltpu.CompilerParams(
            dimension_semantics=("parallel",),            # shard batch across TCs
            vmem_limit_bytes=32 * 1024 * 1024,            # headroom for lane-padded x
        ),
    )(x, w1, b1, w2, b2, w3, b3)

    return out_t.reshape(B, 1)


def init_params(key, input_dim):
    """PyTorch nn.Linear-style init; weights stored (out, in), biases (out, 1)."""
    def linear(key, fan_in, fan_out):
        kw, kb = jax.random.split(key)
        bound = 1.0 / jnp.sqrt(fan_in)
        w = jax.random.uniform(kw, (fan_out, fan_in), jnp.float32, -bound, bound)
        b = jax.random.uniform(kb, (fan_out, 1), jnp.float32, -bound, bound)
        return w, b

    k1, k2, k3 = jax.random.split(key, 3)
    w1, b1 = linear(k1, input_dim, HIDDEN1)
    w2, b2 = linear(k2, HIDDEN1, HIDDEN2)
    w3t, b3 = linear(k3, HIDDEN2, 1)          # (1, 32)
    return (w1, b1, w2, b2, w3t.T, b3)        # w3 stored as a (32, 1) column


def reference(x, params):
    """True-f32 reference (explicit HIGHEST precision)."""
    w1, b1, w2, b2, w3, b3 = params
    hp = lax.Precision.HIGHEST
    h1 = jnp.maximum(jnp.dot(x, w1.T, precision=hp) + b1.T, 0.0)
    h2 = jnp.maximum(jnp.dot(h1, w2.T, precision=hp) + b2.T, 0.0)
    return jnp.dot(h2, w3, precision=hp) + b3.T


if __name__ == "__main__":
    key = jax.random.PRNGKey(0)
    kx, kp, kx2 = jax.random.split(key, 3)

    # Small case matching the module spec (batch=8, input_dim=16): single block.
    batch, input_dim = 8, 16
    params = init_params(kp, input_dim)
    x = jax.random.normal(kx, (batch, input_dim), jnp.float32)
    out = jax.block_until_ready(transaction_predictor(x, params))
    ref = reference(x, params)
    assert out.shape == (batch, 1), out.shape
    assert jnp.allclose(out, ref, atol=1e-5, rtol=1e-5), jnp.max(jnp.abs(out - ref))

    # Multi-step grid: exercises resident weights, the >=2-step clamp, and the
    # ragged last block (no wrapper-side transpose/pad).
    batch2 = 300
    x2 = jax.random.normal(kx2, (batch2, input_dim), jnp.float32)
    out2 = jax.block_until_ready(transaction_predictor(x2, params))
    ref2 = reference(x2, params)
    assert out2.shape == (batch2, 1), out2.shape
    assert jnp.allclose(out2, ref2, atol=1e-5, rtol=1e-5), jnp.max(jnp.abs(out2 - ref2))

    # bf16-MXU-operand fast path (f32 accumulation): looser tolerance.
    out3 = jax.block_until_ready(transaction_predictor(x2, params, mxu_bf16=True))
    assert out3.shape == (batch2, 1), out3.shape
    assert jnp.allclose(out3, ref2, atol=5e-2, rtol=5e-2), jnp.max(jnp.abs(out3 - ref2))

    print("KERNEL_OK")
</pallas_src>

<mosaic_0001>
module attributes {stable_mosaic.version = 11 : i64} {
  func.func @_mlp_kernel(%arg0: i32, %arg1: memref<8x16xf32, #tpu.memory_space<vmem>>, %arg2: memref<64x16xf32, #tpu.memory_space<vmem>>, %arg3: memref<64x1xf32, #tpu.memory_space<vmem>>, %arg4: memref<32x64xf32, #tpu.memory_space<vmem>>, %arg5: memref<32x1xf32, #tpu.memory_space<vmem>>, %arg6: memref<32x1xf32, #tpu.memory_space<vmem>>, %arg7: memref<1x1xf32, #tpu.memory_space<vmem>>, %arg8: memref<1x8xf32, #tpu.memory_space<vmem>>) attributes {dimension_semantics = [#tpu.dimension_semantics<parallel>], iteration_bounds = array<i64: 1>, scalar_prefetch = 0 : i64, scratch_operands = 0 : i64, tpu.core_type = #tpu.core_type<tc>, window_params = [{transform_indices = @transform_0, window_bounds = array<i64: 8, 16>}, {pipeline_mode = #tpu.pipeline_mode<synchronous>, transform_indices = @transform_1, window_bounds = array<i64: 64, 16>}, {pipeline_mode = #tpu.pipeline_mode<synchronous>, transform_indices = @transform_2, window_bounds = array<i64: 64, 1>}, {pipeline_mode = #tpu.pipeline_mode<synchronous>, transform_indices = @transform_3, window_bounds = array<i64: 32, 64>}, {pipeline_mode = #tpu.pipeline_mode<synchronous>, transform_indices = @transform_4, window_bounds = array<i64: 32, 1>}, {pipeline_mode = #tpu.pipeline_mode<synchronous>, transform_indices = @transform_5, window_bounds = array<i64: 32, 1>}, {pipeline_mode = #tpu.pipeline_mode<synchronous>, transform_indices = @transform_6, window_bounds = array<i64: 1, 1>}, {transform_indices = @transform_7, window_bounds = array<i64: 1, 8>}]} {
    %c0 = arith.constant 0 : index
    %c0_0 = arith.constant 0 : index
    %0 = vector.load %arg1[%c0, %c0_0] : memref<8x16xf32, #tpu.memory_space<vmem>>, vector<8x16xf32>
    %c0_1 = arith.constant 0 : index
    %c0_2 = arith.constant 0 : index
    %1 = vector.load %arg2[%c0_1, %c0_2] : memref<64x16xf32, #tpu.memory_space<vmem>>, vector<64x16xf32>
    %c0_3 = arith.constant 0 : index
    %c0_4 = arith.constant 0 : index
    %2 = vector.load %arg4[%c0_3, %c0_4] : memref<32x64xf32, #tpu.memory_space<vmem>>, vector<32x64xf32>
    %cst = arith.constant dense<0.000000e+00> : vector<64x8xf32>
    %3 = tpu.matmul %1, %0, %cst {dimension_numbers = #tpu.dot_dimension_numbers<[1], [1], [0], [0], [0, 0, 1, 0], [], []>, precision = #tpu.contract_precision<fp32>} : vector<64x16xf32>, vector<8x16xf32>, vector<64x8xf32> -> vector<64x8xf32>
    %c0_5 = arith.constant 0 : index
    %c0_6 = arith.constant 0 : index
    %4 = vector.load %arg3[%c0_5, %c0_6] : memref<64x1xf32, #tpu.memory_space<vmem>>, vector<64x1xf32>
    %5 = vector.broadcast %4 : vector<64x1xf32> to vector<64x8xf32>
    %6 = arith.addf %3, %5 : vector<64x8xf32>
    %cst_7 = arith.constant 0.000000e+00 : f32
    %7 = vector.broadcast %cst_7 : f32 to vector<64x8xf32>
    %8 = arith.maximumf %6, %7 : vector<64x8xf32>
    %cst_8 = arith.constant dense<0.000000e+00> : vector<32x8xf32>
    %9 = tpu.matmul %2, %8, %cst_8 {dimension_numbers = #tpu.dot_dimension_numbers<[1], [0], [0], [1], [0, 0, 1, 1], [], []>, precision = #tpu.contract_precision<fp32>} : vector<32x64xf32>, vector<64x8xf32>, vector<32x8xf32> -> vector<32x8xf32>
    %c0_9 = arith.constant 0 : index
    %c0_10 = arith.constant 0 : index
    %10 = vector.load %arg5[%c0_9, %c0_10] : memref<32x1xf32, #tpu.memory_space<vmem>>, vector<32x1xf32>
    %11 = vector.broadcast %10 : vector<32x1xf32> to vector<32x8xf32>
    %12 = arith.addf %9, %11 : vector<32x8xf32>
    %cst_11 = arith.constant 0.000000e+00 : f32
    %13 = vector.broadcast %cst_11 : f32 to vector<32x8xf32>
    %14 = arith.maximumf %12, %13 : vector<32x8xf32>
    %c0_12 = arith.constant 0 : index
    %c0_13 = arith.constant 0 : index
    %15 = vector.load %arg6[%c0_12, %c0_13] : memref<32x1xf32, #tpu.memory_space<vmem>>, vector<32x1xf32>
    %16 = vector.broadcast %15 : vector<32x1xf32> to vector<32x8xf32>
    %17 = arith.mulf %16, %14 : vector<32x8xf32>
    %cst_14 = arith.constant dense<0.000000e+00> : vector<8xf32>
    %18 = vector.multi_reduction <add>, %17, %cst_14 [0] : vector<32x8xf32> to vector<8xf32>
    %19 = vector.shape_cast %18 : vector<8xf32> to vector<1x8xf32>
    %c0_15 = arith.constant 0 : index
    %c0_16 = arith.constant 0 : index
    %20 = vector.load %arg7[%c0_15, %c0_16] : memref<1x1xf32, #tpu.memory_space<vmem>>, vector<1x1xf32>
    %21 = vector.broadcast %20 : vector<1x1xf32> to vector<1x8xf32>
    %22 = arith.addf %19, %21 : vector<1x8xf32>
    %c0_17 = arith.constant 0 : index
    %c0_18 = arith.constant 0 : index
    %23 = vector.load %arg8[%c0_17, %c0_18] : memref<1x8xf32, #tpu.memory_space<vmem>>, vector<1x8xf32>
    tpu.vector_store %arg8[%c0_17, %c0_18], %22 {strides = array<i32>} : memref<1x8xf32, #tpu.memory_space<vmem>>, vector<1x8xf32>,
    return
  }
  func.func @transform_0(%arg0: i32) -> (i32, i32) {
    %c0_i32 = arith.constant 0 : i32
    %c0_i32_0 = arith.constant 0 : i32
    return %arg0, %c0_i32 : i32, i32
  }
  func.func @transform_1(%arg0: i32) -> (i32, i32) {
    %c0_i32 = arith.constant 0 : i32
    %c0_i32_0 = arith.constant 0 : i32
    %c0_i32_1 = arith.constant 0 : i32
    return %c0_i32, %c0_i32_0 : i32, i32
  }
  func.func @transform_2(%arg0: i32) -> (i32, i32) {
    %c0_i32 = arith.constant 0 : i32
    %c0_i32_0 = arith.constant 0 : i32
    %c0_i32_1 = arith.constant 0 : i32
    return %c0_i32, %c0_i32_0 : i32, i32
  }
  func.func @transform_3(%arg0: i32) -> (i32, i32) {
    %c0_i32 = arith.constant 0 : i32
    %c0_i32_0 = arith.constant 0 : i32
    %c0_i32_1 = arith.constant 0 : i32
    return %c0_i32, %c0_i32_0 : i32, i32
  }
  func.func @transform_4(%arg0: i32) -> (i32, i32) {
    %c0_i32 = arith.constant 0 : i32
    %c0_i32_0 = arith.constant 0 : i32
    %c0_i32_1 = arith.constant 0 : i32
    return %c0_i32, %c0_i32_0 : i32, i32
  }
  func.func @transform_5(%arg0: i32) -> (i32, i32) {
    %c0_i32 = arith.constant 0 : i32
    %c0_i32_0 = arith.constant 0 : i32
    %c0_i32_1 = arith.constant 0 : i32
    return %c0_i32, %c0_i32_0 : i32, i32
  }
  func.func @transform_6(%arg0: i32) -> (i32, i32) {
    %c0_i32 = arith.constant 0 : i32
    %c0_i32_0 = arith.constant 0 : i32
    %c0_i32_1 = arith.constant 0 : i32
    return %c0_i32, %c0_i32_0 : i32, i32
  }
  func.func @transform_7(%arg0: i32) -> (i32, i32) {
    %c0_i32 = arith.constant 0 : i32
    %c0_i32_0 = arith.constant 0 : i32
    return %c0_i32, %arg0 : i32, i32
  }
}

</mosaic_0001>

<bundles_post_ra>
// kernel: tpu_custom_call.1
= control target key start
LH: loop header
LB: loop body
LE: loop exit
PB: predicated region body
PF: predicated region fallthrough
CT: control target
= control target key end

     0   :  { %s2518_s0 = inlined_call_operand.vmem [shape: f32[8,16], index: 0, kind: input, shape index: {}]   ;;  %s2519_s1 = inlined_call_operand.vmem [shape: f32[64,16], index: 1, kind: input, shape index: {}]   ;;  %s2520_s2 = inlined_call_operand.vmem [shape: f32[64,1], index: 2, kind: input, shape index: {}]   ;;  %s2521_s3 = inlined_call_operand.vmem [shape: f32[32,64], index: 3, kind: input, shape index: {}]   ;;  %s2522_s4 = inlined_call_operand.vmem [shape: f32[32,1], index: 4, kind: input, shape index: {}]   ;;  %s2523_s5 = inlined_call_operand.vmem [shape: f32[32,1], index: 5, kind: input, shape index: {}]   ;;  %s2524_s6 = inlined_call_operand.<no memory space> [shape: f32[1,1], index: 6, kind: input, shape index: {}]   ;;  %s2525_s7 = inlined_call_operand.hbm [shape: f32[1,8], index: 7, kind: output, shape index: {}]  }
   0x1   :  { %v12_v0 = vstv %s2524_s6 }
   0x2   :  { %13 = vst [vmem:[#allocation2] sm:$0x1] %v12_v0 }
   0x3   :  { %v29_v1 = vld [vmem:[%s2518_s0] sm:$0xff]  ;;  %vm90_vm0 = vcmask 130048   ;;  %v31_v3 = vld [vmem:[%s2519_s1 + $0x8] sm:$0xff]  ;;  %v32_v7 = vld [vmem:[%s2519_s1 + $0x10] sm:$0xff]  ;;  %v2017_v10 = vmov 0  }
   0x4   :  { %v30_v2 = vld [vmem:[%s2519_s1] sm:$0xff]  ;;  %v116_v4 = vsel %vm90_vm0, %v29_v1, 0  ;;  %v95_v6 = vsel %vm90_vm0, %v31_v3, 0  ;;  %v33_v8 = vld [vmem:[%s2519_s1 + $0x18] sm:$0xff]  ;;  %1994 = vset.pattern.permute.xlu1 %v2017_v10  ;;  %1993 = vset.pattern.permute.xlu0 %v2017_v10  ;;  %v98_v14 = vsel %vm90_vm0, %v32_v7, 0  ;;  %v35_v15 = vld [vmem:[%s2519_s1 + $0x28] sm:$0xff] }
   0x5   :  { %v92_v5 = vsel %vm90_vm0, %v30_v2, 0  ;;  %v34_v9 = vld [vmem:[%s2519_s1 + $0x20] sm:$0xff]  ;;  %v2083_v11 = vand.u32 4294901760, %v116_v4  ;;  %v2087_v13 = vand.u32 4294901760, %v95_v6  ;;  %v36_v16 = vld [vmem:[%s2519_s1 + $0x30] sm:$0xff]  ;;  %v2096_v17 = vand.u32 4294901760, %v98_v14 }
   0x6   :  { %v2085_v12 = vand.u32 4294901760, %v92_v5  ;;  %v101_v18 = vsel %vm90_vm0, %v33_v8, 0  ;;  %v104_v19 = vsel %vm90_vm0, %v34_v9, 0  ;;  %v107_v20 = vsel %vm90_vm0, %v35_v15, 0  ;;  %v49_v21 = vld [vmem:[%s2520_s2 + $0x38] sm:$0xff]  ;;  %v47_v26 = vld [vmem:[%s2520_s2 + $0x28] sm:$0xff] }
   0x7   :  { %1775 = vmatprep.subr.mxu0 %v2083_v11  ;;  %v296_v23 = vsub.f32 %v116_v4, %v2083_v11  ;;  %v2110_v24 = vsub.f32 %v95_v6, %v2087_v13  ;;  %v2113_v25 = vand.u32 4294901760, %v101_v18  ;;  %v2120_v27 = vsub.f32 %v98_v14, %v2096_v17  ;;  %87 = vperm.xlu0 %1993, %v49_v21   ;;  %v48_v35 = vld [vmem:[%s2520_s2 + $0x30] sm:$0xff]  ;;  %v46_v40 = vld [vmem:[%s2520_s2 + $0x20] sm:$0xff]  ;;  %v37_v49 = vld [vmem:[%s2519_s1 + $0x38] sm:$0xff] }
   0x8   :  { %v2106_v22 = vsub.f32 %v92_v5, %v2085_v12  ;;  %1791 = vmatprep.mubr.f32.mxu1 %v2085_v12  ;;  %1776 = vmatpush3.xpose.msra.mxu0 %v2083_v11  ;;  %v2122_v28 = vand.u32 4294901760, %v104_v19  ;;  %v2124_v29 = vand.u32 4294901760, %v107_v20  ;;  %v110_v30 = vsel %vm90_vm0, %v36_v16, 0 }
   0x9   :  { %v2128_v32 = vand.u32 4294901760, %v296_v23  ;;  %v196_v33 = vand.u32 4294901760, %v2110_v24  ;;  %1803 = vmatprep.subr.mxu0 %v296_v23  ;;  %v2132_v34 = vsub.f32 %v101_v18, %v2113_v25  ;;  %77 = vperm.xlu1 %1994, %v47_v26   ;;  %v206_v36 = vand.u32 4294901760, %v2120_v27 }
   0xa   :  { %v186_v31 = vand.u32 4294901760, %v2106_v22  ;;  %v2139_v37 = vsub.f32 %v104_v19, %v2122_v28  ;;  %v2142_v38 = vsub.f32 %v107_v20, %v2124_v29  ;;  %v2144_v39 = vand.u32 4294901760, %v110_v30 }
   0xb   :  { %v298_v42 = vsub.f32 %v296_v23, %v2128_v32  ;;  %v197_v43 = vsub.f32 %v2110_v24, %v196_v33  ;;  %v216_v44 = vand.u32 4294901760, %v2132_v34  ;;  %v207_v45 = vsub.f32 %v2120_v27, %v206_v36  ;;  %82 = vperm.xlu0 %1993, %v48_v35  }
   0xc   :  { %v187_v41 = vsub.f32 %v2106_v22, %v186_v31  ;;  %v226_v46 = vand.u32 4294901760, %v2139_v37  ;;  %v236_v47 = vand.u32 4294901760, %v2142_v38  ;;  %v2163_v48 = vsub.f32 %v110_v30, %v2144_v39 }
   0xd   :  { %14 = vsyncpa [#allocation4], 0  ;;  %v299_v51 = vand.u32 4294901760, %v298_v42  ;;  %v198_v52 = vand.u32 4294901760, %v197_v43  ;;  %v217_v53 = vsub.f32 %v2132_v34, %v216_v44  ;;  %72 = vperm.xlu1 %1994, %v46_v40   ;;  %v208_v54 = vand.u32 4294901760, %v207_v45  ;;  %v45_v61 = vld [vmem:[%s2520_s2 + $0x18] sm:$0xff] }
   0xe   :  { %v188_v50 = vand.u32 4294901760, %v187_v41  ;;  %v227_v55 = vsub.f32 %v2139_v37, %v226_v46  ;;  %v246_v56 = vand.u32 4294901760, %v2163_v48  ;;  %v113_v57 = vsel %vm90_vm0, %v37_v49, 0  ;;  %v44_v1 = vld [vmem:[%s2520_s2 + $0x10] sm:$0xff]  ;;  %v43_v4 = vld [vmem:[%s2520_s2 + $0x8] sm:$0xff]  ;;  %v42_v7 = vld [vmem:[%s2520_s2] sm:$0xff] }
   0xf   :  { %1789 = vmatprep.subr.mxu1 %v299_v51  ;;  %v218_v58 = vand.u32 4294901760, %v217_v53  ;;  %v237_v59 = vsub.f32 %v2142_v38, %v236_v47  ;;  %v2179_v60 = vand.u32 4294901760, %v113_v57  ;;  %67 = vperm.xlu0 %1993, %v45_v61   ;;  %v873_v9 = vld [vmem:[%s2522_s4] sm:$0xff]  ;;  %v874_v10 = vld [vmem:[%s2522_s4 + $0x8] sm:$0xff]  ;;  %v875_v14 = vld [vmem:[%s2522_s4 + $0x10] sm:$0xff]  ;;  %vm897_vm1 = vcmask 523264  }
  0x10   :  { %1777 = vmatprep.mubr.f32.mxu0 %v188_v50  ;;  %1790 = vmatpush3.xpose.msra.mxu1 %v299_v51  ;;  %v228_v62 = vand.u32 4294901760, %v227_v55  ;;  %v247_v63 = vsub.f32 %v2163_v48, %v246_v56  ;;  %v876_v15 = vld [vmem:[%s2522_s4 + $0x18] sm:$0xff]  ;;  %v1580_v16 = vld [vmem:[%s2523_s5] sm:$0xff]  ;;  %v1581_v18 = vld [vmem:[%s2523_s5 + $0x8] sm:$0xff]  ;;  %vm1608_vm2 = vcmask 64512   ;;  %vm1633_vm3 = vcmask 57344  }
  0x11   :  { %1778 = vmatmul.mubr.f32.vlgmr.msra.gmra.mxu0 %v198_v52  ;;  %1817 = vmatprep.subr.mxu1 %v2083_v11  ;;  %v2189_v0 = vsub.f32 %v113_v57, %v2179_v60  ;;  %v238_v2 = vand.u32 4294901760, %v237_v59  ;;  %v1582_v19 = vld [vmem:[%s2523_s5 + $0x10] sm:$0xff]  ;;  %v1583_v20 = vld [vmem:[%s2523_s5 + $0x18] sm:$0xff] }
  0x12   :  { %1804 = vmatpush3.xpose.msra.mxu0 %v296_v23  ;;  %1780 = vmatprep.mubr.f32.mxu0 %v208_v54  ;;  %v248_v5 = vand.u32 4294901760, %v247_v63 }
  0x13   :  { %1831 = vmatprep.subr.mxu0 %v2128_v32  ;;  %1792 = vmatmul.mubr.f32.vlgmr.msra.gmra.mxu1 %v2087_v13  ;;  %v256_v3 = vand.u32 4294901760, %v2189_v0 }
  0x14   :  { %1818 = vmatpush3.xpose.msra.mxu1 %v2083_v11  ;;  %1794 = vmatprep.mubr.f32.mxu1 %v2096_v17 }
  0x15   :  { %1781 = vmatmul.mubr.f32.gmra.mxu0 %v218_v58  ;;  %v257_v6 = vsub.f32 %v2189_v0, %v256_v3  ;;  %1845 = vmatprep.subr.mxu1 %v2083_v11 }
  0x16   :  { %1783 = vmatprep.mubr.f32.mxu0 %v228_v62  ;;  %62 = vperm.xlu1 %1994, %v44_v1  }
  0x17   :  { %1795 = vmatmul.mubr.f32.gmra.mxu1 %v2113_v25  ;;  %57 = vperm.xlu0 %1993, %v43_v4   ;;  %v258_v8 = vand.u32 4294901760, %v257_v6 }
  0x18   :  { %1797 = vmatprep.mubr.f32.mxu1 %v2122_v28 }
  0x19   :  { %1784 = vmatmul.mubr.f32.gmra.mxu0 %v238_v2 }
  0x1a   :  { %1786 = vmatprep.mubr.f32.mxu0 %v248_v5  ;;  %52 = vperm.xlu1 %1994, %v42_v7  }
  0x1b   :  { %1798 = vmatmul.mubr.f32.gmra.mxu1 %v2124_v29  ;;  %879 = vperm.xlu0 %1993, %v873_v9  }
  0x1c   :  { %1800 = vmatprep.mubr.f32.mxu1 %v2144_v39 }
  0x1d   :  { %1787 = vmatmul.mubr.f32.gmra.mxu0 %v258_v8 }
  0x1e   :  { %1805 = vmatprep.mubr.f32.mxu0 %v2106_v22  ;;  %884 = vperm.xlu1 %1994, %v874_v10  }
  0x1f   :  { %1801 = vmatmul.mubr.f32.gmra.mxu1 %v2179_v60  ;;  %889 = vperm.xlu0 %1993, %v875_v14  }
  0x20   :  { %1819 = vmatprep.mubr.f32.mxu1 %v186_v31 }
  0x21   :  { %1806 = vmatmul.mubr.f32.vlgmr.msra.gmra.mxu0 %v2110_v24 }
  0x22   :  { %1832 = vmatpush3.xpose.msra.mxu0 %v2128_v32  ;;  %1808 = vmatprep.mubr.f32.mxu0 %v2120_v27 }
  0x23   :  { %894 = vperm.xlu1 %1994, %v876_v15   ;;  %1820 = vmatmul.mubr.f32.vlgmr.msra.gmra.mxu1 %v196_v33 }
  0x24   :  { %1586 = vperm.xlu0 %1993, %v1580_v16   ;;  %1846 = vmatpush3.xpose.msra.mxu1 %v2083_v11  ;;  %v1622_v11 = vld [vmem:[#allocation2] sm:$0x1] }
  0x25   :  { %1809 = vmatmul.mubr.f32.gmra.mxu0 %v2132_v34  ;;  %1822 = vmatprep.mubr.f32.mxu1 %v206_v36 }
  0x26   :  { %1811 = vmatprep.mubr.f32.mxu0 %v2139_v37 }
  0x27   :  { %1591 = vperm.xlu1 %1994, %v1581_v18   ;;  %1823 = vmatmul.mubr.f32.gmra.mxu1 %v216_v44 }
  0x28   :  { %1596 = vperm.xlu0 %1993, %v1582_v19   ;;  %1825 = vmatprep.mubr.f32.mxu1 %v226_v46 }
  0x29   :  { %1812 = vmatmul.mubr.f32.gmra.mxu0 %v2142_v38 }
  0x2a   :  { %1814 = vmatprep.mubr.f32.mxu0 %v2163_v48 }
  0x2b   :  { %1601 = vperm.xlu1 %1994, %v1583_v20   ;;  %1826 = vmatmul.mubr.f32.gmra.mxu1 %v236_v47 }
  0x2c   :  { %1625 = vperm.xlu0 %1993, %v1622_v11   ;;  %1828 = vmatprep.mubr.f32.mxu1 %v246_v56 }
  0x2d   :  { %1815 = vmatmul.mubr.f32.gmra.mxu0 %v2189_v0 }
  0x2e   :  { %1833 = vmatprep.mubr.f32.mxu0 %v2085_v12 }
  0x2f   :  { %1829 = vmatmul.mubr.f32.gmra.mxu1 %v256_v3 }
  0x30   :  { %1847 = vmatprep.mubr.f32.mxu1 %v2085_v12  ;;  %v38_v12 = vld [vmem:[%s2521_s3] sm:$0xff] }
  0x31   :  { %1834 = vmatmul.mubr.f32.vlgmr.msra.gmra.mxu0 %v2087_v13 }
  0x32   :  { %1836 = vmatprep.mubr.f32.mxu0 %v2096_v17 }
  0x33   :  { %1848 = vmatmul.mubr.f32.vlgmr.msra.gmra.mxu1 %v2087_v13  ;;  %v899_v13 = vsel %vm897_vm1, %v38_v12, 0 }
  0x34   :  { %1850 = vmatprep.mubr.f32.mxu1 %v2096_v17  ;;  %v2280_v17 = vand.u32 4294901760, %v899_v13 }
  0x35   :  { %1837 = vmatmul.mubr.f32.gmra.mxu0 %v2113_v25 }
  0x36   :  { %1839 = vmatprep.mubr.f32.mxu0 %v2122_v28  ;;  %v2283_v21 = vsub.f32 %v899_v13, %v2280_v17 }
  0x37   :  { %1851 = vmatmul.mubr.f32.gmra.mxu1 %v2113_v25 }
  0x38   :  { %1853 = vmatprep.mubr.f32.mxu1 %v2122_v28  ;;  %v985_v22 = vand.u32 4294901760, %v2283_v21 }
  0x39   :  { %1840 = vmatmul.mubr.f32.gmra.mxu0 %v2124_v29 }
  0x3a   :  { %1842 = vmatprep.mubr.f32.mxu0 %v2144_v39  ;;  %v986_v23 = vsub.f32 %v2283_v21, %v985_v22 }
  0x3b   :  { %1854 = vmatmul.mubr.f32.gmra.mxu1 %v2124_v29 }
  0x3c   :  { %1856 = vmatprep.mubr.f32.mxu1 %v2144_v39  ;;  %v987_v24 = vand.u32 4294901760, %v986_v23 }
  0x3d   :  { %1843 = vmatmul.mubr.f32.gmra.mxu0 %v2179_v60 }
  0x3e   :  { %1875 = vmatprep.mubr.f32.mxu0 %v987_v24 }
  0x3f   :  { %1857 = vmatmul.mubr.f32.gmra.mxu1 %v2179_v60 }
  0x40   :  { %1897 = vmatprep.mubr.f32.mxu1 %v2280_v17 }
  0x82   :  { %v88_v36 = vpop.permute.xlu0 %87 }
  0x84   :  { %v78_v38 = vpop.permute.xlu1 %77 }
  0x86   :  { %v83_v44 = vpop.permute.xlu0 %82 }
  0x88   :  { %v73_v46 = vpop.permute.xlu1 %72 }
  0x8a   :  { %v68_v52 = vpop.permute.xlu0 %67 }
  0x91   :  { %v63_v54 = vpop.permute.xlu1 %62 }
  0x92   :  { %v58_v62 = vpop.permute.xlu0 %57 }
  0x95   :  { %v53_v1 = vpop.permute.xlu1 %52 }
  0xd1   :  { %v1779_v25 = vpop.f32.mrf.mxu0 }
  0xd2   :  { %v201_v6 = vadd.f32 %v1779_v25, %v58_v62 }
  0xd3   :  { %v190_v26 = vpop.f32.mrf.mxu0  ;;  %v1793_v27 = vpop.f32.mrf.mxu1 }
  0xd4   :  { %v191_v10 = vadd.f32 %v190_v26, %v53_v1  ;;  %v343_v23 = vadd.f32 %v1793_v27, %v201_v6 }
  0xd5   :  { %v1782_v28 = vpop.f32.mrf.mxu0  ;;  %v336_v29 = vpop.f32.mrf.mxu1 }
  0xd6   :  { %v221_v58 = vadd.f32 %v1782_v28, %v68_v52 }
  0xd7   :  { %v210_v30 = vpop.f32.mrf.mxu0  ;;  %v1796_v31 = vpop.f32.mrf.mxu1 }
  0xd8   :  { %v211_v63 = vadd.f32 %v210_v30, %v63_v54  ;;  %v355_v4 = vadd.f32 %v1796_v31, %v221_v58  ;;  %v337_v31 = vadd.f32 %v336_v29, %v191_v10 }
  0xd9   :  { %v1785_v32 = vpop.f32.mrf.mxu0  ;;  %v348_v33 = vpop.f32.mrf.mxu1 }
  0xda   :  { %v241_v60 = vadd.f32 %v1785_v32, %v78_v38  ;;  %v349_v14 = vadd.f32 %v348_v33, %v211_v63 }
  0xdb   :  { %v230_v34 = vpop.f32.mrf.mxu0  ;;  %v1799_v35 = vpop.f32.mrf.mxu1 }
  0xdc   :  { %v231_v2 = vadd.f32 %v230_v34, %v73_v46  ;;  %v367_v7 = vadd.f32 %v1799_v35, %v241_v60 }
  0xdd   :  { %v1788_v37 = vpop.f32.mrf.mxu0  ;;  %v360_v39 = vpop.f32.mrf.mxu1 }
  0xde   :  { %v261_v8 = vadd.f32 %v1788_v37, %v88_v36  ;;  %v361_v18 = vadd.f32 %v360_v39, %v231_v2 }
  0xdf   :  { %v250_v40 = vpop.f32.mrf.mxu0  ;;  %v1802_v41 = vpop.f32.mrf.mxu1 }
  0xe0   :  { %v251_v19 = vadd.f32 %v250_v40, %v83_v44  ;;  %v379_v24 = vadd.f32 %v1802_v41, %v261_v8 }
  0xe1   :  { %v1807_v42 = vpop.f32.mrf.mxu0  ;;  %v372_v43 = vpop.f32.mrf.mxu1 }
  0xe2   :  { %v460_v34 = vadd.f32 %v1807_v42, %v343_v23  ;;  %v373_v35 = vadd.f32 %v372_v43, %v251_v19  ;;  %v39_v42 = vld [vmem:[%s2521_s3 + $0x8] sm:$0xff] }
  0xe3   :  { %v452_v45 = vpop.f32.mrf.mxu0  ;;  %v1821_v47 = vpop.f32.mrf.mxu1  ;;  %v902_v63 = vsel %vm897_vm1, %v39_v42, 0 }
  0xe4   :  { %v453_v40 = vadd.f32 %v452_v45, %v337_v31  ;;  %v584_v52 = vadd.f32 %v1821_v47, %v460_v34  ;;  %v2305_v10 = vand.u32 4294901760, %v902_v63 }
  0xe5   :  { %v1810_v48 = vpop.f32.mrf.mxu0  ;;  %v2290_v49 = vpop.f32.mrf.mxu1 }
  0xe6   :  { %v474_v15 = vadd.f32 %v1810_v48, %v355_v4  ;;  %v2319_v31 = vsub.f32 %v902_v63, %v2305_v10 }
  0xe7   :  { %v466_v50 = vpop.f32.mrf.mxu0  ;;  %v1824_v51 = vpop.f32.mrf.mxu1 }
  0xe8   :  { %v467_v12 = vadd.f32 %v466_v50, %v349_v14  ;;  %v600_v32 = vadd.f32 %v1824_v51, %v474_v15 }
  0xe9   :  { %v1813_v53 = vpop.f32.mrf.mxu0  ;;  %v591_v55 = vpop.f32.mrf.mxu1 }
  0xea   :  { %v488_v20 = vadd.f32 %v1813_v53, %v367_v7  ;;  %v592_v37 = vadd.f32 %v591_v55, %v467_v12  ;;  %v41_v7 = vld [vmem:[%s2521_s3 + $0x18] sm:$0xff] }
  0xeb   :  { %v480_v56 = vpop.f32.mrf.mxu0  ;;  %v1827_v57 = vpop.f32.mrf.mxu1  ;;  %v908_v12 = vsel %vm897_vm1, %v41_v7, 0 }
  0xec   :  { %v481_v28 = vadd.f32 %v480_v56, %v361_v18  ;;  %v616_v36 = vadd.f32 %v1827_v57, %v488_v20  ;;  %v576_v56 = vadd.f32 %v2290_v49, %v453_v40 }
  0xed   :  { %v1816_v59 = vpop.f32.mrf.mxu0  ;;  %v607_v61 = vpop.f32.mrf.mxu1 }
  0xee   :  { %v502_v26 = vadd.f32 %v1816_v59, %v379_v24  ;;  %v608_v44 = vadd.f32 %v607_v61, %v481_v28 }
  0xef   :  { %v494_v0 = vpop.f32.mrf.mxu0  ;;  %v1830_v3 = vpop.f32.mrf.mxu1 }
  0xf0   :  { %v495_v46 = vadd.f32 %v494_v0, %v373_v35  ;;  %v632_v53 = vadd.f32 %v1830_v3, %v502_v26  ;;  %v40_v0 = vld [vmem:[%s2521_s3 + $0x10] sm:$0xff]  ;;  %v2335_v26 = vand.u32 4294901760, %v908_v12  ;;  %s2018_s3 = smov [#allocation3]  }
  0xf1   :  { %v1835_v5 = vpop.f32.mrf.mxu0  ;;  %v623_v9 = vpop.f32.mrf.mxu1  ;;  %v905_v14 = vsel %vm897_vm1, %v40_v0, 0  ;;  %s1641_s29 = sshll.u32 %s2018_s3, 4  ;;  %s1642_s29 = int_to_ptr.vmem [resolvable:$true] %s1641_s29 }
  0xf2   :  { %v712_v45 = vadd.f32 %v1835_v5, %v584_v52  ;;  %v624_v57 = vadd.f32 %v623_v9, %v495_v46  ;;  %s1995_s30 = scalar_lea.vmem %s1642_s29, 16  ;;  %s1999_s8 = scalar_lea.vmem %s1642_s29, 32 }
  0xf3   :  { %v705_v16 = vpop.f32.mrf.mxu0  ;;  %v1849_v11 = vpop.f32.mrf.mxu1  ;;  %p1996_p0 = scmp.ne.s32.totalorder %s1642_s29, %s1995_s30  ;;  %p2000_p1 = scmp.lt.s32.totalorder %s1642_s29, %s1642_s29 }
  0xf4   :  { %v706_v1 = vadd.f32 %v705_v16, %v576_v56  ;;  %v826_v8 = vadd.f32 %v1849_v11, %v712_v45  ;;  %p2001_p2 = scmp.lt.s32.totalorder %s1999_s8, %s1995_s30 }
  0xf5   :  { %v1838_v13 = vpop.f32.mrf.mxu0  ;;  %v819_v30 = vpop.f32.mrf.mxu1 }
  0xf6   :  { %v724_v38 = vadd.f32 %v1838_v13, %v600_v32  ;;  %v820_v20 = vadd.f32 %v819_v30, %v706_v1  ;;  %v866_v28 = vmax.f32 %v826_v8, 0.0  ;;  %v2321_v32 = vand.u32 4294901760, %v905_v14  ;;  %p2002_p3 = por %p2001_p2, %p2000_p1 }
  0xf7   :  { %v717_v25 = vpop.f32.mrf.mxu0  ;;  %v1852_v33 = vpop.f32.mrf.mxu1 }
  0xf8   :  { %v718_v27 = vadd.f32 %v717_v25, %v592_v37  ;;  %v838_v43 = vadd.f32 %v1852_v33, %v724_v38  ;;  %v2350_v40 = vand.u32 4294901760, %v866_v28  ;;  %v2355_v46 = vsub.f32 %v905_v14, %v2321_v32  ;;  %p2003_p4 = pnand %p2002_p3, %p1996_p0 }
  0xf9   :  { %v1841_v39 = vpop.f32.mrf.mxu0  ;;  %v831_v50 = vpop.f32.mrf.mxu1 }
  0xfa   :  { %v736_v48 = vadd.f32 %v1841_v39, %v616_v36  ;;  %v832_v60 = vadd.f32 %v831_v50, %v718_v27  ;;  %v868_v4 = vmax.f32 %v838_v43, 0.0  ;;  %v865_v36 = vmax.f32 %v820_v20, 0.0 }
  0xfb   :  { %v729_v41 = vpop.f32.mrf.mxu0  ;;  %v1855_v51 = vpop.f32.mrf.mxu1 }
  0xfc   :  { %v730_v29 = vadd.f32 %v729_v41, %v608_v44  ;;  %v850_v54 = vadd.f32 %v1855_v51, %v736_v48  ;;  %v867_v15 = vmax.f32 %v832_v60, 0.0  ;;  %v2311_v13 = vand.u32 4294901760, %v868_v4 }
  0xfd   :  { %v1844_v55 = vpop.f32.mrf.mxu0  ;;  %v843_v59 = vpop.f32.mrf.mxu1  ;;  %v995_v44 = vand.u32 4294901760, %v2319_v31  ;;  %v2369_v52 = vand.u32 4294901760, %v865_v36 }
  0xfe   :  { %v748_v58 = vadd.f32 %v1844_v55, %v632_v53  ;;  %v870_v61 = vmax.f32 %v850_v54, 0.0  ;;  %v844_v62 = vadd.f32 %v843_v59, %v730_v29  ;;  %v2323_v25 = vand.u32 4294901760, %v867_v15 }
  0xff   :  { %v741_v47 = vpop.f32.mrf.mxu0  ;;  %v1858_v3 = vpop.f32.mrf.mxu1  ;;  %v2338_v33 = vsub.f32 %v868_v4, %v2311_v13  ;;  %v2373_v53 = vsub.f32 %v908_v12, %v2335_v26  ;;  %v2384_v54 = vsub.f32 %v866_v28, %v2350_v40  ;;  %v1005_v55 = vand.u32 4294901760, %v2355_v46 }
 0x100   :  { %v742_v2 = vadd.f32 %v741_v47, %v624_v57  ;;  %v2300_v6 = vand.u32 4294901760, %v870_v61  ;;  %v869_v49 = vmax.f32 %v844_v62, 0.0  ;;  %v862_v5 = vadd.f32 %v1858_v3, %v748_v58  ;;  %v885_v28 = vpop.permute.xlu1 %884 }
 0x101   :  { %v855_v9 = vpop.f32.mrf.mxu1  ;;  %v2358_v48 = vsub.f32 %v867_v15, %v2323_v25  ;;  %v2381_v43 = vand.u32 4294901760, %v2338_v33  ;;  %v996_v57 = vsub.f32 %v2319_v31, %v995_v44  ;;  %v2398_v59 = vsub.f32 %v865_v36, %v2369_v52 }
 0x102   :  { %v2308_v18 = vand.u32 4294901760, %v869_v49  ;;  %v872_v16 = vmax.f32 %v862_v5, 0.0  ;;  %v856_v19 = vadd.f32 %v855_v9, %v742_v2  ;;  %v2314_v23 = vsub.f32 %v870_v61, %v2300_v6 }
 0x103   :  { %v2395_v58 = vand.u32 4294901760, %v2358_v48  ;;  %v1015_v60 = vand.u32 4294901760, %v2373_v53  ;;  %v1071_v62 = vsub.f32 %v2338_v33, %v2381_v43  ;;  %v1006_v47 = vsub.f32 %v2355_v46, %v1005_v55 }
 0x104   :  { %v2316_v24 = vand.u32 4294901760, %v872_v16  ;;  %v871_v11 = vmax.f32 %v856_v19, 0.0  ;;  %v2326_v30 = vsub.f32 %v869_v49, %v2308_v18  ;;  %v2348_v39 = vand.u32 4294901760, %v2314_v23 }
 0x105   :  { %v2410_v63 = vand.u32 4294901760, %v2384_v54  ;;  %v997_v1 = vand.u32 4294901760, %v996_v57  ;;  %v1078_v2 = vsub.f32 %v2358_v48, %v2395_v58  ;;  %v1016_v3 = vsub.f32 %v2373_v53, %v1015_v60 }
 0x106   :  { %v2329_v34 = vsub.f32 %v872_v16, %v2316_v24  ;;  %v2331_v35 = vand.u32 4294901760, %v871_v11  ;;  %1859 = vmatprep.subr.mxu0 %v2316_v24  ;;  %v2367_v41 = vand.u32 4294901760, %v2326_v30  ;;  %v1057_v42 = vsub.f32 %v2314_v23, %v2348_v39 }
 0x107   :  { %1860 = vmatpush3.msra.mxu0 %v2316_v24  ;;  %v2420_v4 = vand.u32 4294901760, %v2398_v59  ;;  %v1072_v49 = vand.u32 4294901760, %v1071_v62  ;;  %v1007_v5 = vand.u32 4294901760, %v1006_v47  ;;  %v1085_v7 = vsub.f32 %v2384_v54, %v2410_v63 }
 0x108   :  { %v2341_v37 = vsub.f32 %v871_v11, %v2331_v35  ;;  %1861 = vmatprep.subr.mxu0 %v2331_v35  ;;  %v2345_v38 = vand.u32 4294901760, %v2329_v34  ;;  %v1064_v45 = vsub.f32 %v2326_v30, %v2367_v41  ;;  %v1058_v61 = vand.u32 4294901760, %v1057_v42 }
 0x109   :  { %1862 = vmatpush3.msra.mxu0 %v2331_v35  ;;  %v1079_v8 = vand.u32 4294901760, %v1078_v2  ;;  %v1017_v9 = vand.u32 4294901760, %v1016_v3  ;;  %v1092_v14 = vsub.f32 %v2398_v59, %v2420_v4  ;;  %v1086_v15 = vand.u32 4294901760, %v1085_v7 }
 0x10a   :  { %1863 = vmatprep.subr.mxu0 %v2300_v6  ;;  %v1043_v50 = vsub.f32 %v2329_v34, %v2345_v38  ;;  %v2364_v27 = vand.u32 4294901760, %v2341_v37  ;;  %v1065_v0 = vand.u32 4294901760, %v1064_v45 }
 0x10b   :  { %1864 = vmatpush3.msra.mxu0 %v2300_v6  ;;  %v1093_v16 = vand.u32 4294901760, %v1092_v14 }
 0x10c   :  { %1865 = vmatprep.subr.mxu0 %v2308_v18  ;;  %v1044_v29 = vand.u32 4294901760, %v1043_v50  ;;  %v1050_v51 = vsub.f32 %v2341_v37, %v2364_v27 }
 0x10d   :  { %1866 = vmatpush3.msra.mxu0 %v2308_v18 }
 0x10e   :  { %1867 = vmatprep.subr.mxu0 %v2311_v13  ;;  %1881 = vmatprep.subr.mxu1 %v1044_v29  ;;  %v1051_v56 = vand.u32 4294901760, %v1050_v51 }
 0x10f   :  { %1868 = vmatpush3.msra.mxu0 %v2311_v13  ;;  %1882 = vmatpush3.msra.mxu1 %v1044_v29 }
 0x110   :  { %1869 = vmatprep.subr.mxu0 %v2323_v25  ;;  %1883 = vmatprep.subr.mxu1 %v1051_v56 }
 0x111   :  { %1870 = vmatpush3.msra.mxu0 %v2323_v25  ;;  %1884 = vmatpush3.msra.mxu1 %v1051_v56 }
 0x112   :  { %1871 = vmatprep.subr.mxu0 %v2350_v40  ;;  %1885 = vmatprep.subr.mxu1 %v1058_v61 }
 0x113   :  { %1872 = vmatpush3.msra.mxu0 %v2350_v40  ;;  %1886 = vmatpush3.msra.mxu1 %v1058_v61 }
 0x114   :  { %1873 = vmatprep.subr.mxu0 %v2369_v52  ;;  %1887 = vmatprep.subr.mxu1 %v1065_v0 }
 0x115   :  { %1874 = vmatpush3.msra.mxu0 %v2369_v52  ;;  %1888 = vmatpush3.msra.mxu1 %v1065_v0 }
 0x116   :  { %1876 = vmatmul.mubr.f32.vlgmr.msra.gmra.mxu0 %v997_v1  ;;  %1889 = vmatprep.subr.mxu1 %v1072_v49 }
 0x117   :  { %1903 = vmatprep.subr.mxu0 %v2329_v34  ;;  %1890 = vmatpush3.msra.mxu1 %v1072_v49 }
 0x118   :  { %1904 = vmatpush3.msra.mxu0 %v2329_v34  ;;  %1891 = vmatprep.subr.mxu1 %v1079_v8  ;;  %v895_v34 = vpop.permute.xlu1 %894 }
 0x119   :  { %1905 = vmatprep.subr.mxu0 %v2341_v37  ;;  %1878 = vmatprep.mubr.f32.mxu0 %v1007_v5 }
 0x11a   :  { %1892 = vmatpush3.msra.mxu1 %v1079_v8  ;;  %1906 = vmatpush3.msra.mxu0 %v2341_v37 }
 0x11b   :  { %1879 = vmatmul.mubr.f32.gmra.mxu0 %v1017_v9  ;;  %1893 = vmatprep.subr.mxu1 %v1086_v15 }
 0x11c   :  { %1907 = vmatprep.subr.mxu0 %v2314_v23  ;;  %1894 = vmatpush3.msra.mxu1 %v1086_v15  ;;  %v1592_v47 = vpop.permute.xlu1 %1591 }
 0x11d   :  { %1908 = vmatpush3.msra.mxu0 %v2314_v23  ;;  %1895 = vmatprep.subr.mxu1 %v1093_v16 }
 0x11e   :  { %1909 = vmatprep.subr.mxu0 %v2326_v30  ;;  %1896 = vmatpush3.msra.mxu1 %v1093_v16 }
 0x11f   :  { %1910 = vmatpush3.msra.mxu0 %v2326_v30  ;;  %1898 = vmatmul.mubr.f32.vlgmr.msra.gmra.mxu1 %v2305_v10 }
 0x120   :  { %1911 = vmatprep.subr.mxu0 %v2338_v33  ;;  %1925 = vmatprep.subr.mxu1 %v2316_v24  ;;  %v1602_v15 = vpop.permute.xlu1 %1601 }
 0x121   :  { %1912 = vmatpush3.msra.mxu0 %v2338_v33  ;;  %1926 = vmatpush3.msra.mxu1 %v2316_v24 }
 0x122   :  { %1913 = vmatprep.subr.mxu0 %v2358_v48  ;;  %1927 = vmatprep.subr.mxu1 %v2331_v35 }
 0x123   :  { %1900 = vmatprep.mubr.f32.mxu1 %v2321_v32  ;;  %1914 = vmatpush3.msra.mxu0 %v2358_v48 }
 0x124   :  { %1928 = vmatpush3.msra.mxu1 %v2331_v35  ;;  %1915 = vmatprep.subr.mxu0 %v2384_v54 }
 0x125   :  { %1901 = vmatmul.mubr.f32.gmra.mxu1 %v2335_v26  ;;  %1929 = vmatprep.subr.mxu1 %v2300_v6 }
 0x126   :  { %1916 = vmatpush3.msra.mxu0 %v2384_v54  ;;  %1930 = vmatpush3.msra.mxu1 %v2300_v6 }
 0x127   :  { %1917 = vmatprep.subr.mxu0 %v2398_v59  ;;  %1931 = vmatprep.subr.mxu1 %v2308_v18 }
 0x128   :  { %1918 = vmatpush3.msra.mxu0 %v2398_v59  ;;  %1919 = vmatprep.mubr.f32.mxu0 %v2283_v21 }
 0x129   :  { %1932 = vmatpush3.msra.mxu1 %v2308_v18  ;;  %1920 = vmatmul.mubr.f32.vlgmr.msra.gmra.mxu0 %v2319_v31 }
 0x12a   :  { %1933 = vmatprep.subr.mxu1 %v2311_v13  ;;  %1947 = vmatprep.subr.mxu0 %v2345_v38 }
 0x12b   :  { %1934 = vmatpush3.msra.mxu1 %v2311_v13  ;;  %1948 = vmatpush3.msra.mxu0 %v2345_v38 }
 0x12c   :  { %1935 = vmatprep.subr.mxu1 %v2323_v25  ;;  %1949 = vmatprep.subr.mxu0 %v2364_v27 }
 0x12d   :  { %1922 = vmatprep.mubr.f32.mxu0 %v2355_v46  ;;  %1936 = vmatpush3.msra.mxu1 %v2323_v25 }
 0x12e   :  { %1950 = vmatpush3.msra.mxu0 %v2364_v27  ;;  %1937 = vmatprep.subr.mxu1 %v2350_v40 }
 0x12f   :  { %1923 = vmatmul.mubr.f32.gmra.mxu0 %v2373_v53  ;;  %1951 = vmatprep.subr.mxu0 %v2348_v39 }
 0x130   :  { %1938 = vmatpush3.msra.mxu1 %v2350_v40  ;;  %1952 = vmatpush3.msra.mxu0 %v2348_v39 }
 0x131   :  { %1939 = vmatprep.subr.mxu1 %v2369_v52  ;;  %1953 = vmatprep.subr.mxu0 %v2367_v41 }
 0x132   :  { %1940 = vmatpush3.msra.mxu1 %v2369_v52  ;;  %1941 = vmatprep.mubr.f32.mxu1 %v985_v22 }
 0x133   :  { %1954 = vmatpush3.msra.mxu0 %v2367_v41  ;;  %1942 = vmatmul.mubr.f32.vlgmr.msra.gmra.mxu1 %v995_v44 }
 0x134   :  { %1955 = vmatprep.subr.mxu0 %v2381_v43  ;;  %1969 = vmatprep.subr.mxu1 %v2316_v24 }
 0x135   :  { %1956 = vmatpush3.msra.mxu0 %v2381_v43  ;;  %1970 = vmatpush3.msra.mxu1 %v2316_v24 }
 0x136   :  { %1957 = vmatprep.subr.mxu0 %v2395_v58  ;;  %1971 = vmatprep.subr.mxu1 %v2331_v35 }
 0x137   :  { %1944 = vmatprep.mubr.f32.mxu1 %v1005_v55  ;;  %1958 = vmatpush3.msra.mxu0 %v2395_v58 }
 0x138   :  { %1972 = vmatpush3.msra.mxu1 %v2331_v35  ;;  %1959 = vmatprep.subr.mxu0 %v2410_v63 }
 0x139   :  { %1945 = vmatmul.mubr.f32.gmra.mxu1 %v1015_v60  ;;  %1973 = vmatprep.subr.mxu1 %v2300_v6 }
 0x13a   :  { %1960 = vmatpush3.msra.mxu0 %v2410_v63  ;;  %1974 = vmatpush3.msra.mxu1 %v2300_v6 }
 0x13b   :  { %1961 = vmatprep.subr.mxu0 %v2420_v4  ;;  %1975 = vmatprep.subr.mxu1 %v2308_v18 }
 0x13c   :  { %1962 = vmatpush3.msra.mxu0 %v2420_v4  ;;  %1963 = vmatprep.mubr.f32.mxu0 %v2280_v17 }
 0x13d   :  { %1976 = vmatpush3.msra.mxu1 %v2308_v18  ;;  %1964 = vmatmul.mubr.f32.vlgmr.msra.gmra.mxu0 %v2305_v10 }
 0x13e   :  { %1977 = vmatprep.subr.mxu1 %v2311_v13  ;;  %1966 = vmatprep.mubr.f32.mxu0 %v2321_v32 }
 0x13f   :  { %1978 = vmatpush3.msra.mxu1 %v2311_v13  ;;  %1985 = vmatprep.mubr.f32.mxu1 %v2280_v17 }
 0x140   :  { %1979 = vmatprep.subr.mxu1 %v2323_v25 }
 0x141   :  { %1980 = vmatpush3.msra.mxu1 %v2323_v25  ;;  %1967 = vmatmul.mubr.f32.gmra.mxu0 %v2335_v26  ;;  %v880_v25 = vpop.permute.xlu0 %879 }
 0x142   :  { %1981 = vmatprep.subr.mxu1 %v2350_v40 }
 0x143   :  { %1982 = vmatpush3.msra.mxu1 %v2350_v40 }
 0x144   :  { %1983 = vmatprep.subr.mxu1 %v2369_v52 }
 0x145   :  { %1984 = vmatpush3.msra.mxu1 %v2369_v52  ;;  %v890_v40 = vpop.permute.xlu0 %889 }
 0x146   :  { %1986 = vmatmul.mubr.f32.vlgmr.msra.gmra.mxu1 %v2305_v10 }
 0x147   :  { %1988 = vmatprep.mubr.f32.mxu1 %v2321_v32 }
 0x149   :  { %v1587_v58 = vpop.permute.xlu0 %1586 }
 0x14a   :  { %1989 = vmatmul.mubr.f32.gmra.mxu1 %v2335_v26 }
 0x14d   :  { %v1597_v14 = vpop.permute.xlu0 %1596 }
 0x1d6   :  { %v1877_v17 = vpop.f32.mrf.mxu0 }
 0x1d7   :  { %v1000_v30 = vadd.f32 %v1877_v17, %v885_v28 }
 0x1d8   :  { %v989_v21 = vpop.f32.mrf.mxu0 }
 0x1d9   :  { %v990_v35 = vadd.f32 %v989_v21, %v880_v25  ;;  %v1626_v25 = vpop.permute.xlu0 %1625 }
 0x1db   :  { %v1880_v22 = vpop.f32.mrf.mxu0 }
 0x1dc   :  { %v1020_v37 = vadd.f32 %v1880_v22, %v895_v34 }
 0x1dd   :  { %v1009_v18 = vpop.f32.mrf.mxu0 }
 0x1de   :  { %v1010_v44 = vadd.f32 %v1009_v18, %v890_v40 }
 0x1df   :  { %v1899_v6 = vpop.f32.mrf.mxu1 }
 0x1e0   :  { %v1137_v36 = vadd.f32 %v1899_v6, %v1000_v30 }
 0x1e1   :  { %v1130_v19 = vpop.f32.mrf.mxu1 }
 0x1e2   :  { %v1131_v38 = vadd.f32 %v1130_v19, %v990_v35 }
 0x1e5   :  { %v1902_v12 = vpop.f32.mrf.mxu1 }
 0x1e6   :  { %v1149_v46 = vadd.f32 %v1902_v12, %v1020_v37 }
 0x1e7   :  { %v1142_v23 = vpop.f32.mrf.mxu1 }
 0x1e8   :  { %v1143_v52 = vadd.f32 %v1142_v23, %v1010_v44 }
 0x1e9   :  { %v1921_v20 = vpop.f32.mrf.mxu0 }
 0x1ea   :  { %v1244_v39 = vadd.f32 %v1921_v20, %v1137_v36  ;;  %v1628_v20 = vlaneseq }
 0x1eb   :  { %v1236_v13 = vpop.f32.mrf.mxu0 }
 0x1ec   :  { %v1237_v48 = vadd.f32 %v1236_v13, %v1131_v38  ;;  %v1629_v23 = vshrl.u32 %v1628_v20, 7 }
 0x1ee   :  { %v1630_v28 = vsub.s32 0, %v1629_v23 }
 0x1ef   :  { %v1924_v24 = vpop.f32.mrf.mxu0 }
 0x1f0   :  { %v1258_v53 = vadd.f32 %v1924_v24, %v1149_v46  ;;  %v1631_v30 = vrot.slane %v1626_v25, %v1630_v28 }
 0x1f1   :  { %v1250_v31 = vpop.f32.mrf.mxu0 }
 0x1f2   :  { %v1251_v43 = vadd.f32 %v1250_v31, %v1143_v52 }
 0x1f3   :  { %v1943_v11 = vpop.f32.mrf.mxu1 }
 0x1f4   :  { %v1347_v50 = vadd.f32 %v1943_v11, %v1244_v39 }
 0x1f5   :  { %v1338_v10 = vpop.f32.mrf.mxu1 }
 0x1f6   :  { %v1339_v29 = vadd.f32 %v1338_v10, %v1237_v48 }
 0x1f9   :  { %v1946_v26 = vpop.f32.mrf.mxu1 }
 0x1fa   :  { %v1363_v54 = vadd.f32 %v1946_v26, %v1258_v53 }
 0x1fb   :  { %v1354_v27 = vpop.f32.mrf.mxu1 }
 0x1fc   :  { %v1355_v59 = vadd.f32 %v1354_v27, %v1251_v43 }
 0x1fd   :  { %v1965_v32 = vpop.f32.mrf.mxu0 }
 0x1fe   :  { %v1464_v51 = vadd.f32 %v1965_v32, %v1347_v50 }
 0x1ff   :  { %v1457_v33 = vpop.f32.mrf.mxu0 }
 0x200   :  { %v1458_v55 = vadd.f32 %v1457_v33, %v1339_v29 }
 0x201   :  { %v1968_v41 = vpop.f32.mrf.mxu0 }
 0x202   :  { %v1476_v60 = vadd.f32 %v1968_v41, %v1363_v54 }
 0x203   :  { %v1469_v45 = vpop.f32.mrf.mxu0 }
 0x204   :  { %v1470_v0 = vadd.f32 %v1469_v45, %v1355_v59 }
 0x206   :  { %v1987_v42 = vpop.f32.mrf.mxu1 }
 0x207   :  { %v1561_v56 = vadd.f32 %v1987_v42, %v1464_v51 }
 0x208   :  { %v1554_v57 = vpop.f32.mrf.mxu1 }
 0x209   :  { %v1577_v61 = vmax.f32 %v1561_v56, 0.0  ;;  %v1555_v62 = vadd.f32 %v1554_v57, %v1458_v55 }
 0x20a   :  { %v1990_v63 = vpop.f32.mrf.mxu1 }
 0x20b   :  { %v1576_v1 = vmax.f32 %v1555_v62, 0.0  ;;  %v1573_v2 = vadd.f32 %v1990_v63, %v1476_v60  ;;  %v1605_v4 = vmul.f32 %v1592_v47, %v1577_v61 }
 0x20c   :  { %v1566_v3 = vpop.f32.mrf.mxu1 }
 0x20d   :  { %v1604_v49 = vmul.f32 %v1587_v58, %v1576_v1  ;;  %v1579_v5 = vmax.f32 %v1573_v2, 0.0  ;;  %v1567_v7 = vadd.f32 %v1566_v3, %v1470_v0  ;;  %v1610_v16 = vsel %vm1608_vm2, %v1605_v4, 0.0 }
 0x20f   :  { %v1609_v8 = vsel %vm1608_vm2, %v1604_v49, 0.0  ;;  %v1578_v9 = vmax.f32 %v1567_v7, 0.0  ;;  %v1607_v17 = vmul.f32 %v1602_v15, %v1579_v5 }
 0x210   :  { %v1611_v22 = vadd.f32 %v1610_v16, %v1609_v8 }
 0x211   :  { %v1606_v21 = vmul.f32 %v1597_v14, %v1578_v9  ;;  %v1614_v19 = vsel %vm1608_vm2, %v1607_v17, 0.0 }
 0x213   :  { %v1612_v6 = vsel %vm1608_vm2, %v1606_v21, 0.0 }
 0x214   :  { %v1613_v18 = vadd.f32 %v1612_v6, %v1611_v22 }
 0x216   :  { %v1615_v12 = vadd.f32 %v1614_v19, %v1613_v18 }
 0x218   :  { %v1616_v13 = vrot.slane %v1615_v12, 4 }
 0x21a   :  { %v1617_v24 = vadd.f32 %v1616_v13, %v1615_v12 }
 0x21c   :  { %v1618_v11 = vrot.slane %v1617_v24, 2 }
 0x21e   :  { %v1619_v31 = vadd.f32 %v1618_v11, %v1617_v24 }
 0x220   :  { %v1620_v10 = vrot.slane %v1619_v31, 1 }
 0x222   :  { %v1621_v32 = vadd.f32 %v1620_v10, %v1619_v31 }
 0x224   :  { %v1632_v34 = vadd.f32 %v1631_v30, %v1621_v32 }
 0x226   :  { %1634 = vst.msk [vmem:[#allocation3] sm:$0x1] %vm1633_vm3, %v1632_v34 }
 0x227   :  { %2006 = shalt.err (!%p2003_p4)
}
 0x228   :  { %1644 = dma.vmem_to_hbm [thread:$0]  %s1642_s29, 16, %s2525_s7, [#allocation4]  }
 0x229   :  { %2015 = dma.done.wait [#allocation4], 16  }
 0x22a   :  { %2016 = vsyncadd [#allocation4], 4294967280 }
 0x22b   :  { %1648 = vsyncpa [#allocation4], 1 }

</bundles_post_ra>
